<compile_context>
chip_gen: v5e
topology: v5e:2x2
jax: 0.10.0
libtpu: 0.0.40
codegen_flags: <defaults>
</compile_context>

<pallas_src>
import functools

import jax
import jax.numpy as jnp
from jax.experimental import pallas as pl
from jax.experimental.pallas import tpu as pltpu


def _round_up(x, m):
    return (x + m - 1) // m * m


def _default_vmem_limit_bytes():
    # v5e/v6e: 128 MiB VMEM per TensorCore; v7x: 64 MiB. Derive the scoped
    # limit from hardware and leave headroom for Mosaic-internal scratch.
    try:
        cap = int(pltpu.get_tpu_info().vmem_capacity_bytes)
    except Exception:  # older jax / no TPU query available
        cap = 128 * 1024 * 1024
    return max(32 * 1024 * 1024, min((cap * 3) // 4, 96 * 1024 * 1024))


def _linear_kernel(mat_ref, w_ref, b_ref, o_ref):
    # mat_ref: (TM, K)   compute dtype (bf16/f32), streamed over the M grid
    # w_ref:   (K, Fp)   compute dtype, resident across the grid (block (0,0))
    # b_ref:   (1, Fp)   f32, resident
    # o_ref:   (TM, F)   output dtype; F may be < Fp (masked store, no HBM pad)
    acc = jnp.dot(mat_ref[...], w_ref[...], preferred_element_type=jnp.float32)
    acc = acc + b_ref[...]
    o_ref[...] = acc[:, : o_ref.shape[-1]].astype(o_ref.dtype)


@functools.partial(
    jax.jit,
    static_argnames=("in_feats", "out_feats", "tile_m", "use_bf16",
                     "out_dtype", "buffer_count"))
def onering_conv_forward(x, neigh_orders, weight, bias, *, in_feats, out_feats,
                         tile_m=2048, use_bf16=True, out_dtype=None,
                         buffer_count=2):
    """x: (N, in_feats, B); neigh_orders: (7*N,) int32;
    weight: (out_feats, 7*in_feats); bias: (out_feats,)."""
    N, C, B = x.shape
    assert C == in_feats
    F = out_feats
    K = 7 * C
    M = B * N
    odt = x.dtype if out_dtype is None else out_dtype

    compute_dtype = jnp.bfloat16 if use_bf16 else x.dtype

    # ---- layout fix + neighbor gather (XLA glue) ----
    # One transpose/cast of the *small* x only, so the gather streams bf16 rows
    # and the (B, 7N, C) -> (B*N, 7C) reshape is a free row-major reshape (no
    # transposes of the 7x-expanded intermediate are materialized).
    x_bnc = jnp.transpose(x, (2, 0, 1)).astype(compute_dtype)   # (B, N, C)
    # TODO(synk): data-dependent row gather -- see module docstring above.
    mat = jnp.take(x_bnc, neigh_orders, axis=1)                 # (B, 7N, C)
    mat2d = mat.reshape(M, K)                                    # (M, 7C)

    # ---- MXU-side padding only: weight/bias padded to Fp lanes, HBM out is F ----
    Fp = _round_up(F, 128)
    w_t = weight.T.astype(compute_dtype)                         # (K, F)
    b_row = bias.astype(jnp.float32).reshape(1, F)                # (1, F)
    if Fp != F:
        w_t = jnp.pad(w_t, ((0, 0), (0, Fp - F)))
        b_row = jnp.pad(b_row, ((0, 0), (0, Fp - F)))

    # ---- tiling over M (rows independent; partial last block handled by Pallas) ----
    tm = min(tile_m, _round_up(M, 8))
    grid_m = pl.cdiv(M, tm)

    # Streamed input; optionally deepen prefetch if DMA is exposed in traces.
    if buffer_count > 2:
        mat_spec = pl.BlockSpec((tm, K), lambda i: (i, 0),
                                pipeline_mode=pl.Buffered(buffer_count))
    else:
        mat_spec = pl.BlockSpec((tm, K), lambda i: (i, 0))

    bytes_accessed = (mat2d.size * mat2d.dtype.itemsize
                      + w_t.size * w_t.dtype.itemsize
                      + b_row.size * 4
                      + M * F * jnp.dtype(odt).itemsize)
    cost = pl.CostEstimate(flops=2 * M * K * Fp, transcendentals=0,
                           bytes_accessed=bytes_accessed)

    out2d = pl.pallas_call(
        _linear_kernel,
        out_shape=jax.ShapeDtypeStruct((M, F), odt),
        grid=(grid_m,),
        in_specs=[
            mat_spec,                                   # (tm, K) streamed over M
            pl.BlockSpec((K, Fp), lambda i: (0, 0)),    # weight, resident
            pl.BlockSpec((1, Fp), lambda i: (0, 0)),    # bias, resident
        ],
        out_specs=pl.BlockSpec((tm, F), lambda i: (i, 0)),
        compiler_params=pltpu.CompilerParams(
            dimension_semantics=("parallel",),           # megacore shards M on v7x
            vmem_limit_bytes=_default_vmem_limit_bytes()),
        cost_estimate=cost,
    )(mat2d, w_t, b_row)

    # ---- output layout: (M, F) -> (B, N, F) -> (N, F, B) (free when B == 1) ----
    out = out2d.reshape(B, N, F)
    out = jnp.transpose(out, (1, 2, 0))
    return out


def _reference(x, neigh_orders, weight, bias, in_feats):
    # Pure-JAX (f32) reference mirroring the PyTorch forward exactly.
    mat = x[neigh_orders]
    mat = jnp.swapaxes(mat, 0, 2)
    mat = jnp.swapaxes(mat, 1, 2)
    mat = mat.reshape(mat.shape[0], -1, 7 * in_feats)
    out = mat @ weight.T + bias
    out = jnp.swapaxes(out, 1, 2)
    out = jnp.swapaxes(out, 0, 2)
    return out


if __name__ == "__main__":
    in_feats = 4
    out_feats = 8
    n_vertices = 16
    batch = 2

    key = jax.random.PRNGKey(0)
    k_x, k_w, k_b, k_n = jax.random.split(key, 4)

    # input in the module's layout: (N_vertices, in_feats, batch)
    x = jax.random.normal(k_x, (n_vertices, in_feats, batch), dtype=jnp.float32)

    # deterministic synthetic 1-ring neighborhood: 7 neighbor indices per vertex
    neigh_orders = jax.random.randint(
        k_n, (7 * n_vertices,), 0, n_vertices, dtype=jnp.int32)

    # nn.Linear(7*in_feats, out_feats) parameters (deterministic init)
    fan_in = 7 * in_feats
    bound = 1.0 / (fan_in ** 0.5)
    weight = jax.random.uniform(
        k_w, (out_feats, fan_in), minval=-bound, maxval=bound, dtype=jnp.float32)
    bias = jax.random.uniform(
        k_b, (out_feats,), minval=-bound, maxval=bound, dtype=jnp.float32)

    out = onering_conv_forward(
        x, neigh_orders, weight, bias, in_feats=in_feats, out_feats=out_feats)
    out = jax.block_until_ready(out)

    ref = _reference(x, neigh_orders, weight, bias, in_feats)
    assert out.shape == (n_vertices, out_feats, batch), out.shape
    # bf16 matmul operands with f32 accumulation -> tolerance sized for bf16.
    max_err = float(jnp.max(jnp.abs(out - ref)))
    assert jnp.allclose(out, ref, atol=2e-2, rtol=2e-2), max_err

    print("KERNEL_OK")
</pallas_src>

<mosaic_0001>
module attributes {stable_mosaic.version = 11 : i64} {
  func.func @_linear_kernel(%arg0: i32, %arg1: memref<32x28xbf16, #tpu.memory_space<vmem>>, %arg2: memref<28x128xbf16, #tpu.memory_space<vmem>>, %arg3: memref<1x128xf32, #tpu.memory_space<vmem>>, %arg4: memref<32x8xf32, #tpu.memory_space<vmem>>) attributes {dimension_semantics = [#tpu.dimension_semantics<parallel>], iteration_bounds = array<i64: 1>, scalar_prefetch = 0 : i64, scratch_operands = 0 : i64, tpu.core_type = #tpu.core_type<tc>, window_params = [{transform_indices = @transform_0, window_bounds = array<i64: 32, 28>}, {pipeline_mode = #tpu.pipeline_mode<synchronous>, transform_indices = @transform_1, window_bounds = array<i64: 28, 128>}, {pipeline_mode = #tpu.pipeline_mode<synchronous>, transform_indices = @transform_2, window_bounds = array<i64: 1, 128>}, {transform_indices = @transform_3, window_bounds = array<i64: 32, 8>}]} {
    %c0 = arith.constant 0 : index
    %c0_0 = arith.constant 0 : index
    %0 = vector.load %arg1[%c0, %c0_0] : memref<32x28xbf16, #tpu.memory_space<vmem>>, vector<32x28xbf16>
    %c0_1 = arith.constant 0 : index
    %c0_2 = arith.constant 0 : index
    %1 = vector.load %arg2[%c0_1, %c0_2] : memref<28x128xbf16, #tpu.memory_space<vmem>>, vector<28x128xbf16>
    %cst = arith.constant dense<0.000000e+00> : vector<32x128xf32>
    %2 = tpu.matmul %0, %1, %cst {dimension_numbers = #tpu.dot_dimension_numbers<[1], [0], [0], [1], [0, 0, 1, 1], [], []>} : vector<32x28xbf16>, vector<28x128xbf16>, vector<32x128xf32> -> vector<32x128xf32>
    %c0_3 = arith.constant 0 : index
    %c0_4 = arith.constant 0 : index
    %3 = vector.load %arg3[%c0_3, %c0_4] : memref<1x128xf32, #tpu.memory_space<vmem>>, vector<1x128xf32>
    %4 = vector.broadcast %3 : vector<1x128xf32> to vector<32x128xf32>
    %5 = arith.addf %2, %4 : vector<32x128xf32>
    %6 = vector.extract_strided_slice %5 {offsets = [0, 0], sizes = [32, 8], strides = [1, 1]} : vector<32x128xf32> to vector<32x8xf32>
    %c0_5 = arith.constant 0 : index
    %c0_6 = arith.constant 0 : index
    %7 = vector.load %arg4[%c0_5, %c0_6] : memref<32x8xf32, #tpu.memory_space<vmem>>, vector<32x8xf32>
    tpu.vector_store %arg4[%c0_5, %c0_6], %6 {strides = array<i32>} : memref<32x8xf32, #tpu.memory_space<vmem>>, vector<32x8xf32>,
    return
  }
  func.func @transform_0(%arg0: i32) -> (i32, i32) {
    %c0_i32 = arith.constant 0 : i32
    %c0_i32_0 = arith.constant 0 : i32
    return %arg0, %c0_i32 : i32, i32
  }
  func.func @transform_1(%arg0: i32) -> (i32, i32) {
    %c0_i32 = arith.constant 0 : i32
    %c0_i32_0 = arith.constant 0 : i32
    %c0_i32_1 = arith.constant 0 : i32
    return %c0_i32, %c0_i32_0 : i32, i32
  }
  func.func @transform_2(%arg0: i32) -> (i32, i32) {
    %c0_i32 = arith.constant 0 : i32
    %c0_i32_0 = arith.constant 0 : i32
    %c0_i32_1 = arith.constant 0 : i32
    return %c0_i32, %c0_i32_0 : i32, i32
  }
  func.func @transform_3(%arg0: i32) -> (i32, i32) {
    %c0_i32 = arith.constant 0 : i32
    %c0_i32_0 = arith.constant 0 : i32
    return %arg0, %c0_i32 : i32, i32
  }
}

</mosaic_0001>

<bundles_post_ra>
// kernel: onering_conv_forward.1
= control target key start
LH: loop header
LB: loop body
LE: loop exit
PB: predicated region body
PF: predicated region fallthrough
CT: control target
= control target key end

     0   :  { %vm55_vm0 = vcmask 1045504   ;;  %vm48_vm1 = vcmask 228352   ;;  %vm78_vm2 = vcmask 64512   ;;  %s162_s1 = inlined_call_operand.vmem [shape: bf16[28,128], index: 1, kind: input, shape index: {}]   ;;  %s163_s2 = inlined_call_operand.vmem [shape: f32[1,128], index: 2, kind: input, shape index: {}]   ;;  %s164_s0 = inlined_call_operand.vmem [shape: bf16[32,28], index: 0, kind: input, shape index: {}]   ;;  %s165_s3 = inlined_call_operand.vmem [shape: f32[32,8], index: 3, kind: output, shape index: {}]  }
   0x1   :  { %v101_v0 = vld [vmem:[%s162_s1 + $0x8] sm:$0xf]  ;;  %v108_v1 = vld [vmem:[%s162_s1 + $0x8] sm:$0x30]  ;;  %v107_v4 = vld [vmem:[%s162_s1] sm:$0xff] }
   0x2   :  { %v102_v2 = vor.u32 %v108_v1, %v101_v0  ;;  %v105_v5 = vld [vmem:[%s164_s0] sm:$0xff]  ;;  %v106_v6 = vld [vmem:[%s164_s0 + $0x8] sm:$0xff] }
   0x3   :  { %v111_v7 = vld [vmem:[%s163_s2] ss:$0 sm:$0xff] }
   0x4   :  { %v57_v3 = vsel %vm55_vm0, %v102_v2, 0 }
   0x5   :  { %65 = vmatpush.bf16.msra.mxu0 %v57_v3  ;;  %109 = vmatpush.bf16.msra.mxu1 %v57_v3 }
   0x9   :  { %66 = vmatpush.bf16.msra.mxu0 %v107_v4  ;;  %110 = vmatpush.bf16.msra.mxu1 %v107_v4 }
   0xc   :  { %103 = vmatmul.msk.bf16.vlgmr.msra.gmra.mxu0 %vm48_vm1, %v105_v5  ;;  %104 = vmatmul.msk.bf16.vlgmr.msra.gmra.mxu1 %vm48_vm1, %v106_v6 }
  0x89   :  { %v68_v8 = vpop.f32.mrf.mxu0  ;;  %v73_v9 = vpop.f32.mrf.mxu1 }
  0x8a   :  { %v69_v10 = vadd.f32 %v111_v7, %v68_v8  ;;  %v74_v11 = vadd.f32 %v111_v7, %v73_v9 }
  0x8c   :  { %79 = vst.msk [vmem:[%s165_s3] sm:$0xff] %vm78_vm2, %v69_v10 }
  0x8d   :  { %81 = vst.msk [vmem:[%s165_s3 + $0x10] sm:$0xff] %vm78_vm2, %v74_v11 }
  0x91   :  { %v70_v12 = vpop.f32.mrf.mxu0  ;;  %v75_v13 = vpop.f32.mrf.mxu1 }
  0x92   :  { %v71_v14 = vadd.f32 %v111_v7, %v70_v12  ;;  %v76_v15 = vadd.f32 %v111_v7, %v75_v13 }
  0x94   :  { %80 = vst.msk [vmem:[%s165_s3 + $0x8] sm:$0xff] %vm78_vm2, %v71_v14 }
  0x95   :  { %82 = vst.msk [vmem:[%s165_s3 + $0x18] sm:$0xff] %vm78_vm2, %v76_v15 }

</bundles_post_ra>
